<compile_context>
chip_gen: v7x
topology: tpu7x:2x2x1
jax: 0.10.0
libtpu: 0.0.40
codegen_flags: <defaults>
</compile_context>

<pallas_src>
import functools

import jax
import jax.numpy as jnp
from jax.experimental import pallas as pl
from jax.experimental.pallas import tpu as pltpu

NEG_SLOPE = 0.2


# --------------------------------------------------------------------------------------
# Kernel A: wide projection + attention logits
# --------------------------------------------------------------------------------------
def gat_project_kernel(x_ref, w_ref, attl_ref, attr_ref, xw_ref, a1_ref, a2_ref):
    # x_ref    : [T_row, F_in]
    # w_ref    : [F_in, H*C]     (full-width projection -> one MXU matmul for all heads)
    # attl_ref : [H*C, H]        block-diagonal att_l  (attl[h*C+c, h] = att_l[h, c])
    # attr_ref : [H*C, H]        block-diagonal att_r
    # xw_ref   : [T_row, H*C]    projected features (stored in the MXU operand dtype)
    # a1_ref   : [T_row, H]      src logits  a1[n,h] = <xw[n, h, :], att_l[h]>
    # a2_ref   : [T_row, H]      dst logits
    xw = jnp.dot(x_ref[...], w_ref[...], preferred_element_type=jnp.float32)
    xw_ref[...] = xw.astype(xw_ref.dtype)
    # Per-head reductions as tiny MXU matmuls (keeps them off the VPU/XLU, no transpose).
    a1_ref[...] = jnp.dot(xw, attl_ref[...], preferred_element_type=jnp.float32)
    a2_ref[...] = jnp.dot(xw, attr_ref[...], preferred_element_type=jnp.float32)


# --------------------------------------------------------------------------------------
# Kernel B: per-destination-tile edge softmax + SPMV aggregation (all heads per step)
# --------------------------------------------------------------------------------------
def gat_edge_softmax_spmv_kernel(a1_ref, a2_ref, xw_ref, adj_ref, out_ref, *,
                                 heads, out_channels):
    # a1_ref  : [H, N]        f32   src logits (one row per head -> broadcasts without transpose)
    # a2_ref  : [T_dst, H]    f32   dst logits for this tile
    # xw_ref  : [N, H*C]      bf16  projected features of ALL source nodes (resident)
    # adj_ref : [T_dst, N]          {0,1} adjacency row tile (streamed; shared by all heads)
    # out_ref : [T_dst, H*C]  f32   lane-dense output tile
    # Additive mask bias, computed ONCE per tile: edge -> 0, non-edge -> -1e30.
    # exp(-1e30 - mx) underflows to exactly 0, so no second masked select is needed.
    bias = (adj_ref[...].astype(jnp.float32) - 1.0) * 1e30

    a1 = a1_ref[...]
    a2 = a2_ref[...]
    xw = xw_ref[...]

    outs = []
    for h in range(heads):  # static unroll; every head reuses the same adj tile from VMEM
        e = a2[:, h:h + 1] + a1[h:h + 1, :]                    # [T_dst, N]
        e = jnp.where(e >= 0.0, e, NEG_SLOPE * e)              # leaky_relu (f32 on the VPU)
        e = e + bias
        mx = jnp.max(e, axis=-1, keepdims=True)                # [T_dst, 1]
        alpha = jnp.exp(e - mx)                                # masked edges -> exact 0
        z = jnp.sum(alpha, axis=-1, keepdims=True)             # [T_dst, 1] normalizer
        inv_z = pl.reciprocal(z, approx=True)                  # EUP slot, not a VPU divide
        agg = jnp.dot(alpha.astype(xw.dtype),                  # bf16 x bf16 on the MXU
                      xw[:, h * out_channels:(h + 1) * out_channels],
                      preferred_element_type=jnp.float32)      # [T_dst, C]
        outs.append(agg * inv_z)

    # One lane-dense store of the whole [T_dst, H*C] tile (no per-head masked stores).
    out_ref[...] = jnp.concatenate(outs, axis=-1)


# --------------------------------------------------------------------------------------
# Wrapper
# --------------------------------------------------------------------------------------
def _pick_tile(n, max_tile):
    """Largest tile <= max_tile that divides n and is a multiple of 8; else the full n."""
    if n <= max_tile:
        return n
    for t in range(max_tile, 7, -8):
        if n % t == 0:
            return t
    return n


def gat_spmv_conv(x, weight, att_l, att_r, adj, *, heads, out_channels,
                  mxu_dtype=jnp.bfloat16, t_row_max=256, t_dst_max=128):
    N, fin = x.shape
    hc = heads * out_channels
    assert weight.shape == (fin, hc)
    assert adj.shape == (N, N)

    # Block-diagonal attention matrices: attl_mat[h*C + c, h] = att_l[h, c].
    eye = jnp.eye(heads, dtype=jnp.float32)
    attl_mat = (att_l[:, :, 0][:, :, None] * eye[:, None, :]).reshape(hc, heads)
    attr_mat = (att_r[:, :, 0][:, :, None] * eye[:, None, :]).reshape(hc, heads)

    # ---------------- Kernel A: projection + logits (row-tiled, parallel) ----------------
    t_row = _pick_tile(N, t_row_max)
    xw, a1, a2 = pl.pallas_call(
        gat_project_kernel,
        out_shape=(
            jax.ShapeDtypeStruct((N, hc), mxu_dtype),        # xw (MXU operand dtype)
            jax.ShapeDtypeStruct((N, heads), jnp.float32),   # a1 (src logits)
            jax.ShapeDtypeStruct((N, heads), jnp.float32),   # a2 (dst logits)
        ),
        grid=(N // t_row,),
        in_specs=[
            pl.BlockSpec((t_row, fin), lambda i: (i, 0)),
            pl.BlockSpec((fin, hc), lambda i: (0, 0)),
            pl.BlockSpec((hc, heads), lambda i: (0, 0)),
            pl.BlockSpec((hc, heads), lambda i: (0, 0)),
        ],
        out_specs=(
            pl.BlockSpec((t_row, hc), lambda i: (i, 0)),
            pl.BlockSpec((t_row, heads), lambda i: (i, 0)),
            pl.BlockSpec((t_row, heads), lambda i: (i, 0)),
        ),
        compiler_params=pltpu.CompilerParams(dimension_semantics=("parallel",)),
    )(x, weight, attl_mat, attr_mat)

    a1_t = a1.T  # [H, N] src logits, one row per head (tiny)

    # -------------- Kernel B: edge softmax + SPMV (dst-tiled, parallel) ------------------
    t_dst = _pick_tile(N, t_dst_max)
    adj_bytes = jnp.dtype(adj.dtype).itemsize
    mxu_bytes = jnp.dtype(mxu_dtype).itemsize
    # Rough per-step VMEM footprint: resident xw/a1 + double-buffered tiles + f32 temporaries.
    vmem_est = (N * hc * mxu_bytes + heads * N * 4
                + 2 * (t_dst * N * adj_bytes + t_dst * heads * 4 + t_dst * hc * 4)
                + 4 * t_dst * N * 4)
    vmem_limit = int(min(max(2 * vmem_est, 16 * 1024 * 1024), 48 * 1024 * 1024))

    out = pl.pallas_call(
        functools.partial(gat_edge_softmax_spmv_kernel,
                          heads=heads, out_channels=out_channels),
        out_shape=jax.ShapeDtypeStruct((N, hc), jnp.float32),
        grid=(N // t_dst,),
        in_specs=[
            pl.BlockSpec((heads, N), lambda d: (0, 0)),       # a1 (resident)
            pl.BlockSpec((t_dst, heads), lambda d: (d, 0)),   # a2 dst-tile
            pl.BlockSpec((N, hc), lambda d: (0, 0)),          # xw (resident)
            pl.BlockSpec((t_dst, N), lambda d: (d, 0)),       # adj dst row-tile (streamed)
        ],
        out_specs=pl.BlockSpec((t_dst, hc), lambda d: (d, 0)),
        compiler_params=pltpu.CompilerParams(
            dimension_semantics=("parallel",),
            vmem_limit_bytes=vmem_limit,
        ),
    )(a1_t, a2, xw, adj)

    return out  # already [N, H*C] — no post-call transpose / reshape


# --------------------------------------------------------------------------------------
# Pure-JAX reference of the PyTorch forward semantics (f32 throughout)
# --------------------------------------------------------------------------------------
def gat_reference(x, weight, att_l, att_r, adj, *, heads, out_channels):
    N = x.shape[0]
    xw = x @ weight                                           # [N, H*C]
    xw = xw.reshape(N, heads, out_channels)                   # [N, H, C]
    head_x = xw.transpose(1, 0, 2)                            # [H, N, C]
    a1 = jnp.einsum("hnc,hc->hn", head_x, att_l[:, :, 0]).T   # [N, H]  (src)
    a2 = jnp.einsum("hnc,hc->hn", head_x, att_r[:, :, 0]).T   # [N, H]  (dst)
    e = a2[:, None, :] + a1[None, :, :]                       # [dst, src, H]
    e = jnp.where(e >= 0.0, e, NEG_SLOPE * e)
    mask = (adj > 0.0)[:, :, None]
    e = jnp.where(mask, e, -1e30)
    mx = jnp.max(e, axis=1, keepdims=True)
    alpha = jnp.where(mask, jnp.exp(e - mx), 0.0)
    z = jnp.sum(alpha, axis=1)                                # [dst, H]
    agg = jnp.einsum("dsh,shc->dhc", alpha, xw)               # [dst, H, C]
    out = agg / z[:, :, None]
    return out.reshape(N, heads * out_channels)


def glorot(key, shape):
    fan = shape[-2] + shape[-1]
    stdv = (6.0 / fan) ** 0.5
    return jax.random.uniform(key, shape, jnp.float32, minval=-stdv, maxval=stdv)


if __name__ == "__main__":
    N, in_channels, out_channels, heads = 64, 32, 16, 4

    key = jax.random.PRNGKey(0)
    k_x, k_w, k_al, k_ar, k_adj = jax.random.split(key, 5)

    x = jax.random.normal(k_x, (N, in_channels), jnp.float32)
    weight = glorot(k_w, (in_channels, heads * out_channels))
    att_l = glorot(k_al, (heads, out_channels, 1))
    att_r = glorot(k_ar, (heads, out_channels, 1))

    # Random sparse graph + self loops (every destination has >= 1 incoming edge).
    adj = (jax.random.uniform(k_adj, (N, N)) < 0.15).astype(jnp.float32)
    adj = jnp.maximum(adj, jnp.eye(N, dtype=jnp.float32))     # adj[dst, src]
    adj = adj.astype(jnp.bfloat16)                            # {0,1} exact; halves N^2 stream

    out = gat_spmv_conv(x, weight, att_l, att_r, adj,
                        heads=heads, out_channels=out_channels)
    out = jax.block_until_ready(out)

    ref = gat_reference(x, weight, att_l, att_r, adj.astype(jnp.float32),
                        heads=heads, out_channels=out_channels)

    assert out.shape == (N, heads * out_channels)
    assert bool(jnp.all(jnp.isfinite(out)))
    # Tolerance accommodates bf16 MXU operands (alpha, xw) and the EUP approx reciprocal.
    assert jnp.allclose(out, ref, atol=3e-2, rtol=3e-2), "mismatch vs reference"

    print("KERNEL_OK")
</pallas_src>

<mosaic_0001>
module attributes {stable_mosaic.version = 11 : i64} {
  func.func @gat_project_kernel(%arg0: i32, %arg1: memref<64x32xf32, #tpu.memory_space<vmem>>, %arg2: memref<32x64xf32, #tpu.memory_space<vmem>>, %arg3: memref<64x4xf32, #tpu.memory_space<vmem>>, %arg4: memref<64x4xf32, #tpu.memory_space<vmem>>, %arg5: memref<64x64xbf16, #tpu.memory_space<vmem>>, %arg6: memref<64x4xf32, #tpu.memory_space<vmem>>, %arg7: memref<64x4xf32, #tpu.memory_space<vmem>>) attributes {dimension_semantics = [#tpu.dimension_semantics<parallel>], iteration_bounds = array<i64: 1>, scalar_prefetch = 0 : i64, scratch_operands = 0 : i64, tpu.core_type = #tpu.core_type<tc>, window_params = [{transform_indices = @transform_0, window_bounds = array<i64: 64, 32>}, {pipeline_mode = #tpu.pipeline_mode<synchronous>, transform_indices = @transform_1, window_bounds = array<i64: 32, 64>}, {pipeline_mode = #tpu.pipeline_mode<synchronous>, transform_indices = @transform_2, window_bounds = array<i64: 64, 4>}, {pipeline_mode = #tpu.pipeline_mode<synchronous>, transform_indices = @transform_3, window_bounds = array<i64: 64, 4>}, {transform_indices = @transform_4, window_bounds = array<i64: 64, 64>}, {transform_indices = @transform_5, window_bounds = array<i64: 64, 4>}, {transform_indices = @transform_6, window_bounds = array<i64: 64, 4>}]} {
    %c0 = arith.constant 0 : index
    %c0_0 = arith.constant 0 : index
    %0 = vector.load %arg1[%c0, %c0_0] : memref<64x32xf32, #tpu.memory_space<vmem>>, vector<64x32xf32>
    %c0_1 = arith.constant 0 : index
    %c0_2 = arith.constant 0 : index
    %1 = vector.load %arg2[%c0_1, %c0_2] : memref<32x64xf32, #tpu.memory_space<vmem>>, vector<32x64xf32>
    %cst = arith.constant dense<0.000000e+00> : vector<64x64xf32>
    %2 = tpu.matmul %0, %1, %cst {dimension_numbers = #tpu.dot_dimension_numbers<[1], [0], [0], [1], [0, 0, 1, 1], [], []>} : vector<64x32xf32>, vector<32x64xf32>, vector<64x64xf32> -> vector<64x64xf32>
    %3 = arith.truncf %2 : vector<64x64xf32> to vector<64x64xbf16>
    %c0_3 = arith.constant 0 : index
    %c0_4 = arith.constant 0 : index
    %4 = vector.load %arg5[%c0_3, %c0_4] : memref<64x64xbf16, #tpu.memory_space<vmem>>, vector<64x64xbf16>
    tpu.vector_store %arg5[%c0_3, %c0_4], %3 {strides = array<i32>} : memref<64x64xbf16, #tpu.memory_space<vmem>>, vector<64x64xbf16>,
    %c0_5 = arith.constant 0 : index
    %c0_6 = arith.constant 0 : index
    %5 = vector.load %arg3[%c0_5, %c0_6] : memref<64x4xf32, #tpu.memory_space<vmem>>, vector<64x4xf32>
    %cst_7 = arith.constant dense<0.000000e+00> : vector<64x4xf32>
    %6 = tpu.matmul %2, %5, %cst_7 {dimension_numbers = #tpu.dot_dimension_numbers<[1], [0], [0], [1], [0, 0, 1, 1], [], []>} : vector<64x64xf32>, vector<64x4xf32>, vector<64x4xf32> -> vector<64x4xf32>
    %c0_8 = arith.constant 0 : index
    %c0_9 = arith.constant 0 : index
    %7 = vector.load %arg6[%c0_8, %c0_9] : memref<64x4xf32, #tpu.memory_space<vmem>>, vector<64x4xf32>
    tpu.vector_store %arg6[%c0_8, %c0_9], %6 {strides = array<i32>} : memref<64x4xf32, #tpu.memory_space<vmem>>, vector<64x4xf32>,
    %c0_10 = arith.constant 0 : index
    %c0_11 = arith.constant 0 : index
    %8 = vector.load %arg4[%c0_10, %c0_11] : memref<64x4xf32, #tpu.memory_space<vmem>>, vector<64x4xf32>
    %cst_12 = arith.constant dense<0.000000e+00> : vector<64x4xf32>
    %9 = tpu.matmul %2, %8, %cst_12 {dimension_numbers = #tpu.dot_dimension_numbers<[1], [0], [0], [1], [0, 0, 1, 1], [], []>} : vector<64x64xf32>, vector<64x4xf32>, vector<64x4xf32> -> vector<64x4xf32>
    %c0_13 = arith.constant 0 : index
    %c0_14 = arith.constant 0 : index
    %10 = vector.load %arg7[%c0_13, %c0_14] : memref<64x4xf32, #tpu.memory_space<vmem>>, vector<64x4xf32>
    tpu.vector_store %arg7[%c0_13, %c0_14], %9 {strides = array<i32>} : memref<64x4xf32, #tpu.memory_space<vmem>>, vector<64x4xf32>,
    return
  }
  func.func @transform_0(%arg0: i32) -> (i32, i32) {
    %c0_i32 = arith.constant 0 : i32
    %c0_i32_0 = arith.constant 0 : i32
    return %arg0, %c0_i32 : i32, i32
  }
  func.func @transform_1(%arg0: i32) -> (i32, i32) {
    %c0_i32 = arith.constant 0 : i32
    %c0_i32_0 = arith.constant 0 : i32
    %c0_i32_1 = arith.constant 0 : i32
    return %c0_i32, %c0_i32_0 : i32, i32
  }
  func.func @transform_2(%arg0: i32) -> (i32, i32) {
    %c0_i32 = arith.constant 0 : i32
    %c0_i32_0 = arith.constant 0 : i32
    %c0_i32_1 = arith.constant 0 : i32
    return %c0_i32, %c0_i32_0 : i32, i32
  }
  func.func @transform_3(%arg0: i32) -> (i32, i32) {
    %c0_i32 = arith.constant 0 : i32
    %c0_i32_0 = arith.constant 0 : i32
    %c0_i32_1 = arith.constant 0 : i32
    return %c0_i32, %c0_i32_0 : i32, i32
  }
  func.func @transform_4(%arg0: i32) -> (i32, i32) {
    %c0_i32 = arith.constant 0 : i32
    %c0_i32_0 = arith.constant 0 : i32
    return %arg0, %c0_i32 : i32, i32
  }
  func.func @transform_5(%arg0: i32) -> (i32, i32) {
    %c0_i32 = arith.constant 0 : i32
    %c0_i32_0 = arith.constant 0 : i32
    return %arg0, %c0_i32 : i32, i32
  }
  func.func @transform_6(%arg0: i32) -> (i32, i32) {
    %c0_i32 = arith.constant 0 : i32
    %c0_i32_0 = arith.constant 0 : i32
    return %arg0, %c0_i32 : i32, i32
  }
}

</mosaic_0001>

<bundles_post_ra>
// kernel: tpu_custom_call.1
= control target key start
LH: loop header
LB: loop body
LE: loop exit
PB: predicated region body
PF: predicated region fallthrough
CT: control target
= control target key end

     0   :  { %vm33_vm0 = vcmask 261120   ;;  %s961_s0 = inlined_call_operand.vmem [shape: f32[64,32], index: 0, kind: input, shape index: {}]   ;;  %s962_s1 = inlined_call_operand.vmem [shape: f32[32,64], index: 1, kind: input, shape index: {}]   ;;  %s963_s2 = inlined_call_operand.vmem [shape: f32[64,4], index: 2, kind: input, shape index: {}]   ;;  %s964_s3 = inlined_call_operand.vmem [shape: f32[64,4], index: 3, kind: input, shape index: {}]   ;;  %s965_s4 = inlined_call_operand.hbm [shape: bf16[64,64], index: 4, kind: output, shape index: {0}]   ;;  %s966_s5 = inlined_call_operand.vmem [shape: f32[64,4], index: 5, kind: output, shape index: {1}]   ;;  %s967_s6 = inlined_call_operand.vmem [shape: f32[64,4], index: 6, kind: output, shape index: {2}]  }
   0x1   :  { %v29_v0 = vld [vmem:[%s962_s1] sm:$0xff]  ;;  %v30_v1 = vld [vmem:[%s962_s1 + $0x8] sm:$0xff]  ;;  %v31_v2 = vld [vmem:[%s962_s1 + $0x10] sm:$0xff] }
   0x2   :  { %v656_v3 = vpack.c.bf16 %v30_v1, %v29_v0  ;;  %v32_v4 = vld [vmem:[%s962_s1 + $0x18] sm:$0xff]  ;;  %v21_v5 = vld [vmem:[%s961_s0] sm:$0xff]  ;;  %v205_v8 = vld [vmem:[%s963_s2 + $0x8] sm:$0xff] }
   0x3   :  { %v660_v6 = vpack.c.bf16 %v32_v4, %v31_v2  ;;  %588 = vmatprep.mubr.msk.f32.mxu0 %vm33_vm0, %v21_v5  ;;  %v204_v7 = vld [vmem:[%s963_s2] sm:$0xff]  ;;  %v352_v11 = vld [vmem:[%s964_s3 + $0x8] sm:$0xff]  ;;  %v206_v12 = vld [vmem:[%s963_s2 + $0x10] sm:$0xff] }
   0x4   :  { %657 = vmatprep.subr.bf16.mxu0 %v656_v3  ;;  %v351_v9 = vld [vmem:[%s964_s3] sm:$0xff]  ;;  %v664_v10 = vpack.c.bf16 %v205_v8, %v204_v7  ;;  %v207_v13 = vld [vmem:[%s963_s2 + $0x18] sm:$0xff]  ;;  %v353_v16 = vld [vmem:[%s964_s3 + $0x10] sm:$0xff] }
   0x5   :  { %659 = vmatpush3.bf16.msra.mxu0 %v656_v3  ;;  %v680_v14 = vpack.c.bf16 %v352_v11, %v351_v9  ;;  %v668_v15 = vpack.c.bf16 %v207_v13, %v206_v12  ;;  %v354_v17 = vld [vmem:[%s964_s3 + $0x18] sm:$0xff]  ;;  %v208_v18 = vld [vmem:[%s963_s2 + $0x20] sm:$0xff]  ;;  %v209_v19 = vld [vmem:[%s963_s2 + $0x28] sm:$0xff] }
   0x6   :  { %661 = vmatprep.subr.bf16.mxu0 %v660_v6  ;;  %665 = vmatprep.subr.bf16.mxu1 %v664_v10  ;;  %v22_v20 = vld [vmem:[%s961_s0 + $0x8] sm:$0xff]  ;;  %v23_v21 = vld [vmem:[%s961_s0 + $0x10] sm:$0xff]  ;;  %v684_v22 = vpack.c.bf16 %v354_v17, %v353_v16 }
   0x7   :  { %667 = vmatpush3.bf16.msra.mxu1 %v664_v10 }
   0x8   :  { %669 = vmatprep.subr.bf16.mxu1 %v668_v15 }
   0x9   :  { %663 = vmatpush3.bf16.msra.mxu0 %v660_v6 }
   0xa   :  { %681 = vmatprep.subr.bf16.mxu0 %v680_v14 }
   0xb   :  { %12 = vsyncpa [#allocation3], 0  ;;  %v672_v23 = vpack.c.bf16 %v209_v19, %v208_v18  ;;  %v355_v24 = vld [vmem:[%s964_s3 + $0x20] sm:$0xff]  ;;  %v356_v25 = vld [vmem:[%s964_s3 + $0x28] sm:$0xff]  ;;  %671 = vmatpush3.bf16.msra.mxu1 %v668_v15  ;;  %vm212_vm1 = vcmask 523264   ;;  %vm195_vm2 = vcmask 519168  }
   0xc   :  { %589 = vmatmul.mubr.msk.f32.vlgmr.msra.gmra.mrb[0].mxu0 %vm33_vm0, %v22_v20  ;;  %v210_v26 = vld [vmem:[%s963_s2 + $0x30] sm:$0xff]  ;;  %v211_v27 = vld [vmem:[%s963_s2 + $0x38] sm:$0xff]  ;;  %v25_v29 = vld [vmem:[%s961_s0 + $0x20] sm:$0xff]  ;;  %v688_v30 = vpack.c.bf16 %v356_v25, %v355_v24 }
   0xd   :  { %591 = vmatprep.mubr.msk.f32.mxu0 %vm33_vm0, %v23_v21  ;;  %v24_v28 = vld [vmem:[%s961_s0 + $0x18] sm:$0xff]  ;;  %683 = vmatpush3.bf16.msra.mxu0 %v680_v14  ;;  %v676_v31 = vpack.c.bf16 %v211_v27, %v210_v26  ;;  %v357_v32 = vld [vmem:[%s964_s3 + $0x30] sm:$0xff]  ;;  %v26_v34 = vld [vmem:[%s961_s0 + $0x28] sm:$0xff] }
   0xe   :  { %685 = vmatprep.subr.bf16.mxu0 %v684_v22  ;;  %673 = vmatprep.subr.bf16.mxu1 %v672_v23  ;;  %v358_v33 = vld [vmem:[%s964_s3 + $0x38] sm:$0xff]  ;;  %v27_v35 = vld [vmem:[%s961_s0 + $0x30] sm:$0xff] }
   0xf   :  { %675 = vmatpush3.bf16.msra.mxu1 %v672_v23  ;;  %v692_v36 = vpack.c.bf16 %v358_v33, %v357_v32  ;;  %v28_v37 = vld [vmem:[%s961_s0 + $0x38] sm:$0xff]  ;;  %s731_s0 = smov [#allocation2]  }
  0x10   :  { %592 = vmatmul.mubr.msk.f32.gmra.mrb[2].mxu0 %vm33_vm0, %v24_v28  ;;  %677 = vmatprep.subr.bf16.mxu1 %v676_v31  ;;  %s477_s25 = sshll.u32 %s731_s0, 4  ;;  %s478_s25 = int_to_ptr.vmem [resolvable:$true] %s477_s25 }
  0x11   :  { %594 = vmatprep.mubr.msk.f32.mxu0 %vm33_vm0, %v25_v29  ;;  %687 = vmatpush3.bf16.msra.mxu0 %v684_v22  ;;  %s707_s26 = scalar_lea.vmem %s478_s25, 512  ;;  %p712_p1 = scmp.lt.s32.totalorder %s478_s25, %s478_s25 }
  0x12   :  { %689 = vmatprep.subr.bf16.mxu0 %v688_v30  ;;  %p708_p0 = scmp.ne.s32.totalorder %s478_s25, %s707_s26  ;;  %p713_p2 = scmp.lt.s32.totalorder %s707_s26, %s707_s26 }
  0x13   :  { %679 = vmatpush3.bf16.msra.mxu1 %v676_v31 }
  0x14   :  { %595 = vmatmul.mubr.msk.f32.gmra.mrb[4].mxu0 %vm33_vm0, %v26_v34  ;;  %696 = vmatprep.subr.bf16.mxu1 %v680_v14  ;;  %p714_p3 = por %p713_p2, %p712_p1 }
  0x15   :  { %597 = vmatprep.mubr.msk.f32.mxu0 %vm33_vm0, %v27_v35  ;;  %691 = vmatpush3.bf16.msra.mxu0 %v688_v30 }
  0x16   :  { %693 = vmatprep.subr.bf16.mxu0 %v692_v36  ;;  %p715_p4 = pnand %p714_p3, %p708_p0 }
  0x18   :  { %598 = vmatmul.mubr.msk.f32.gmra.mrb[6].mxu0 %vm33_vm0, %v28_v37 }
  0x19   :  { %695 = vmatpush3.bf16.msra.mxu0 %v692_v36 }
  0xdf   :  { %v590_v38 = vpop.f32.mrb[0].mxu0 }
  0xe0   :  { %v529_v39 = vpack.c.bf16 %v590_v38, %v590_v38  ;;  %v124_v40 = vpop.f32.mrb[1].mxu0 }
  0xe1   :  { %v528_v41 = vpack.c.bf16 %v124_v40, %v124_v40  ;;  %616 = vmatprep.mubr.msk.f32.mxu1 %vm212_vm1, %v124_v40  ;;  %644 = vmatprep.mubr.msk.f32.mxu0 %vm212_vm1, %v124_v40 }
  0xe2   :  { %197 = vst.msk [vmem:[#allocation2 + $0x4] sm:$0xf] %vm195_vm2, %v529_v39  ;;  %617 = vmatmul.mubr.msk.f32.vlgmr.msra.gmra.mrb[0].mxu1 %vm212_vm1, %v590_v38  ;;  %645 = vmatmul.mubr.msk.f32.vlgmr.msra.gmra.mrb[8].mxu0 %vm212_vm1, %v590_v38 }
  0xe3   :  { %196 = vst.msk [vmem:[#allocation2] sm:$0xf] %vm195_vm2, %v528_v41  ;;  %700 = vmatpush3.bf16.msra.mxu1 %v680_v14  ;;  %v593_v42 = vpop.f32.mrb[2].mxu0 }
  0xe4   :  { %v531_v43 = vpack.c.bf16 %v593_v42, %v593_v42  ;;  %v134_v44 = vpop.f32.mrb[3].mxu0  ;;  %697 = vmatprep.subr.bf16.mxu1 %v684_v22 }
  0xe5   :  { %v530_v45 = vpack.c.bf16 %v134_v44, %v134_v44  ;;  %619 = vmatprep.mubr.msk.f32.mxu1 %vm212_vm1, %v134_v44  ;;  %647 = vmatprep.mubr.msk.f32.mxu0 %vm212_vm1, %v134_v44 }
  0xe6   :  { %199 = vst.msk [vmem:[#allocation2 + $0xc] sm:$0xf] %vm195_vm2, %v531_v43  ;;  %620 = vmatmul.mubr.msk.f32.gmra.mrb[2].mxu1 %vm212_vm1, %v593_v42  ;;  %648 = vmatmul.mubr.msk.f32.gmra.mrb[10].mxu0 %vm212_vm1, %v593_v42 }
  0xe7   :  { %198 = vst.msk [vmem:[#allocation2 + $0x8] sm:$0xf] %vm195_vm2, %v530_v45  ;;  %701 = vmatpush3.bf16.msra.mxu1 %v684_v22  ;;  %v596_v46 = vpop.f32.mrb[4].mxu0 }
  0xe8   :  { %v533_v47 = vpack.c.bf16 %v596_v46, %v596_v46  ;;  %v144_v48 = vpop.f32.mrb[5].mxu0  ;;  %698 = vmatprep.subr.bf16.mxu1 %v688_v30 }
  0xe9   :  { %v532_v49 = vpack.c.bf16 %v144_v48, %v144_v48  ;;  %622 = vmatprep.mubr.msk.f32.mxu1 %vm212_vm1, %v144_v48  ;;  %650 = vmatprep.mubr.msk.f32.mxu0 %vm212_vm1, %v144_v48 }
  0xea   :  { %201 = vst.msk [vmem:[#allocation2 + $0x14] sm:$0xf] %vm195_vm2, %v533_v47  ;;  %623 = vmatmul.mubr.msk.f32.gmra.mrb[4].mxu1 %vm212_vm1, %v596_v46  ;;  %651 = vmatmul.mubr.msk.f32.gmra.mrb[12].mxu0 %vm212_vm1, %v596_v46 }
  0xeb   :  { %200 = vst.msk [vmem:[#allocation2 + $0x10] sm:$0xf] %vm195_vm2, %v532_v49  ;;  %702 = vmatpush3.bf16.msra.mxu1 %v688_v30  ;;  %v599_v50 = vpop.f32.mrb[6].mxu0 }
  0xec   :  { %v535_v51 = vpack.c.bf16 %v599_v50, %v599_v50  ;;  %v154_v52 = vpop.f32.mrb[7].mxu0  ;;  %699 = vmatprep.subr.bf16.mxu1 %v692_v36 }
  0xed   :  { %v534_v53 = vpack.c.bf16 %v154_v52, %v154_v52  ;;  %625 = vmatprep.mubr.msk.f32.mxu1 %vm212_vm1, %v154_v52 }
  0xee   :  { %203 = vst.msk [vmem:[#allocation2 + $0x1c] sm:$0xf] %vm195_vm2, %v535_v51  ;;  %626 = vmatmul.mubr.msk.f32.gmra.mrb[6].mxu1 %vm212_vm1, %v599_v50 }
  0xef   :  { %202 = vst.msk [vmem:[#allocation2 + $0x18] sm:$0xf] %vm195_vm2, %v534_v53  ;;  %703 = vmatpush3.bf16.msra.mxu1 %v692_v36  ;;  %653 = vmatprep.mubr.msk.f32.mxu1 %vm212_vm1, %v154_v52 }
  0xf2   :  { %654 = vmatmul.mubr.msk.f32.vlgmr.msra.gmra.mrb[8].mxu1 %vm212_vm1, %v599_v50 }
  0xf3   :  { %718 = shalt.err (!%p715_p4)
}
  0xf4   :  { %s719_s29 = scalar_lea.hbm %s965_s4, 512 }
  0xf5   :  { %p720_p5 = scmp.ne.s32.totalorder %s965_s4, %s719_s29  ;;  %p723_p6 = scmp.lt.u32.totalorder %s719_s29, %s965_s4 }
  0xf7   :  { %p725_p7 = pnand %p723_p6, %p720_p5 }
  0xf9   :  { %728 = shalt.err (!%p725_p7)
}
  0xfa   :  { %s732_s10 = smov 64   ;;  %s733_s11 = smov 4   ;;  %vm342_vm3 = vcmask 31744  }
  0xfb   :  { %483 = dma.vmem_to_hbm [thread:$0]  %s478_s25, 512, %s965_s4, [#allocation3], %s732_s10, %s732_s10, %s733_s11  }
 0x1b5   :  { %v618_v54 = vpop.f32.mrb[0].mxu1  ;;  %v646_v55 = vpop.f32.mrb[8].mxu0 }
 0x1b6   :  { %344 = vst.msk [vmem:[%s966_s5 + $0x8] sm:$0xff] %vm342_vm3, %v618_v54  ;;  %465 = vst.msk [vmem:[%s967_s6 + $0x8] sm:$0xff] %vm342_vm3, %v646_v55  ;;  %v303_v56 = vpop.f32.mrb[1].mxu1  ;;  %v425_v57 = vpop.f32.mrb[9].mxu0 }
 0x1b7   :  { %343 = vst.msk [vmem:[%s966_s5] sm:$0xff] %vm342_vm3, %v303_v56  ;;  %464 = vst.msk [vmem:[%s967_s6] sm:$0xff] %vm342_vm3, %v425_v57 }
 0x1b9   :  { %v621_v58 = vpop.f32.mrb[2].mxu1  ;;  %v649_v59 = vpop.f32.mrb[10].mxu0 }
 0x1ba   :  { %346 = vst.msk [vmem:[%s966_s5 + $0x18] sm:$0xff] %vm342_vm3, %v621_v58  ;;  %467 = vst.msk [vmem:[%s967_s6 + $0x18] sm:$0xff] %vm342_vm3, %v649_v59  ;;  %v313_v60 = vpop.f32.mrb[3].mxu1  ;;  %v435_v61 = vpop.f32.mrb[11].mxu0 }
 0x1bb   :  { %345 = vst.msk [vmem:[%s966_s5 + $0x10] sm:$0xff] %vm342_vm3, %v313_v60  ;;  %466 = vst.msk [vmem:[%s967_s6 + $0x10] sm:$0xff] %vm342_vm3, %v435_v61 }
 0x1bd   :  { %v624_v62 = vpop.f32.mrb[4].mxu1  ;;  %v652_v63 = vpop.f32.mrb[12].mxu0 }
 0x1be   :  { %348 = vst.msk [vmem:[%s966_s5 + $0x28] sm:$0xff] %vm342_vm3, %v624_v62  ;;  %469 = vst.msk [vmem:[%s967_s6 + $0x28] sm:$0xff] %vm342_vm3, %v652_v63  ;;  %v323_v0 = vpop.f32.mrb[5].mxu1  ;;  %v445_v1 = vpop.f32.mrb[13].mxu0 }
 0x1bf   :  { %347 = vst.msk [vmem:[%s966_s5 + $0x20] sm:$0xff] %vm342_vm3, %v323_v0  ;;  %468 = vst.msk [vmem:[%s967_s6 + $0x20] sm:$0xff] %vm342_vm3, %v445_v1 }
 0x1c1   :  { %v627_v2 = vpop.f32.mrb[6].mxu1 }
 0x1c2   :  { %350 = vst.msk [vmem:[%s966_s5 + $0x38] sm:$0xff] %vm342_vm3, %v627_v2  ;;  %v333_v3 = vpop.f32.mrb[7].mxu1 }
 0x1c3   :  { %349 = vst.msk [vmem:[%s966_s5 + $0x30] sm:$0xff] %vm342_vm3, %v333_v3 }
 0x1c5   :  { %v655_v4 = vpop.f32.mrb[8].mxu1 }
 0x1c6   :  { %471 = vst.msk [vmem:[%s967_s6 + $0x38] sm:$0xff] %vm342_vm3, %v655_v4  ;;  %v455_v5 = vpop.f32.mrb[9].mxu1 }
 0x1c7   :  { %470 = vst.msk [vmem:[%s967_s6 + $0x30] sm:$0xff] %vm342_vm3, %v455_v5 }
 0x1c8   :  { %729 = dma.done.wait [#allocation3], 512  }
 0x1c9   :  { %730 = vsyncadd [#allocation3], 4294966784 }
 0x1ca   :  { %495 = vsyncpa [#allocation3], 1 }

</bundles_post_ra>
